<compile_context>
chip_gen: v6e
topology: v6e:2x2x1
jax: 0.10.0
libtpu: 0.0.40
codegen_flags: <defaults>
</compile_context>

<pallas_src>
import functools

import jax
import jax.numpy as jnp
from jax import lax
from jax.experimental import pallas as pl
from jax.experimental.pallas import tpu as pltpu


def _punitive_loss_kernel(x_ref, tgt_ref, out_ref, *, total_rows, num_classes):
    i = pl.program_id(0)

    x = x_ref[...].astype(jnp.float32)            # (TN, C) compute in f32
    tgt = tgt_ref[...]                            # (TN, 1) int32
    tn, c = x.shape

    # ---- softmax statistics: single exp pass over (TN, C) ----------------
    m = jnp.max(x, axis=1, keepdims=True)                     # (TN, 1)
    shifted = x - m                                           # (TN, C)
    e = jnp.exp(shifted)                                      # only full-tile EUP pass
    sum_e = jnp.sum(e, axis=1, keepdims=True)                 # (TN, 1)
    sum_e2 = jnp.sum(e * e, axis=1, keepdims=True)            # (TN, 1)
    inv = pl.reciprocal(sum_e, approx=False)                  # exact, per-row only
    lse = jnp.log(sum_e)                                      # (TN, 1)

    # ---- target column: one masked reduce, then a per-row exp ------------
    col = lax.broadcasted_iota(jnp.int32, (tn, c), 1)
    shifted_t = jnp.sum(jnp.where(col == tgt, shifted, 0.0), axis=1, keepdims=True)
    p_t = jnp.exp(shifted_t) * inv                            # (TN, 1)

    # nll[i] = -log_probs[i, t] = lse - shifted[i, t]
    nll = lse - shifted_t                                     # (TN, 1)

    # punish[i] = sum_{j != t} (1 - p_j)^2
    #           = [C - 2*sum_j p_j + sum_j p_j^2] - (1 - p_t)^2
    #           = (C - 2) + sum(e^2)/denom^2 - (1 - p_t)^2
    sq_sum = (num_classes - 2.0) + sum_e2 * (inv * inv)       # (TN, 1)
    punish = sq_sum - (1.0 - p_t) ** 2                        # (TN, 1)

    # ---- mask padded rows of a partial last tile, tile partial sum -------
    row = lax.broadcasted_iota(jnp.int32, (tn, 1), 0) + i * tn
    per_row = jnp.where(row < total_rows, nll + 0.1 * punish, 0.0)

    partial = jnp.sum(per_row)                                # scalar for this tile
    # Lane-dense, unmasked store of this tile's partial sum into its own
    # output block (grid axis is "parallel" -> both v7x TensorCores usable).
    out_ref[...] = jnp.broadcast_to(partial, out_ref.shape)


def _auto_block_rows(c, itemsize, vmem_limit_bytes):
    """Pick TN (multiple of 8) so the streamed logits block is ~2 MiB, clamped
    so 2x double-buffered input + ~4 f32 (TN, C) temporaries fit the VMEM
    budget with headroom."""
    target_block_bytes = 2 * 1024 * 1024
    tn = target_block_bytes // max(1, c * itemsize)
    budget = int(vmem_limit_bytes * 0.7)
    per_row_bytes = 2 * c * itemsize + 4 * c * 4
    tn = min(tn, budget // max(1, per_row_bytes))
    return max(8, (tn // 8) * 8)


def custom_punitive_loss(logits, target, *, block_rows=None,
                         vmem_limit_bytes=48 * 1024 * 1024):
    """logits: (N, C) float (any float dtype); target: (N,) int.  Scalar f32."""
    n, c = logits.shape
    itemsize = jnp.dtype(logits.dtype).itemsize

    if block_rows is None:
        tn = _auto_block_rows(c, itemsize, vmem_limit_bytes)
    else:
        tn = max(8, (block_rows // 8) * 8)       # satisfy the (8, 128) rule
    if tn >= n:
        tn = n                                   # single block == full array dim
    num_tiles = pl.cdiv(n, tn)

    tgt2d = target.astype(jnp.int32).reshape(n, 1)
    kernel = functools.partial(_punitive_loss_kernel, total_rows=n, num_classes=c)

    partials = pl.pallas_call(
        kernel,
        out_shape=jax.ShapeDtypeStruct((num_tiles, 8, 128), jnp.float32),
        grid_spec=pltpu.PrefetchScalarGridSpec(
            num_scalar_prefetch=0,
            grid=(num_tiles,),
            in_specs=[
                pl.BlockSpec((tn, c), lambda i: (i, 0)),   # logits, native dtype
                pl.BlockSpec((tn, 1), lambda i: (i, 0)),   # targets
            ],
            out_specs=pl.BlockSpec((1, 8, 128), lambda i: (i, 0, 0)),
        ),
        compiler_params=pltpu.CompilerParams(
            dimension_semantics=("parallel",),
            vmem_limit_bytes=vmem_limit_bytes,
        ),
    )(logits, tgt2d)

    # Final reduction outside the kernel: sum of per-tile partials, then mean.
    return jnp.sum(partials[:, 0, 0]) / jnp.float32(n)


def _reference(logits, target):
    # Pure-JAX reference mirroring the PyTorch forward.
    log_probs = jax.nn.log_softmax(logits.astype(jnp.float32), axis=1)
    probs = jnp.exp(log_probs)
    n, c = logits.shape
    nll = -log_probs[jnp.arange(n), target]
    onehot = jax.nn.one_hot(target, c, dtype=jnp.float32)
    punish = jnp.sum((1.0 - probs) ** 2 * (1.0 - onehot), axis=1)
    return jnp.mean(nll + 0.1 * punish)


if __name__ == "__main__":
    key = jax.random.PRNGKey(0)
    k1, k2 = jax.random.split(key)

    # Small demo shapes: 22 samples, 128 classes (full 128-lane class dim).
    N, C = 22, 128
    logits = jax.random.normal(k1, (N, C), dtype=jnp.float32)
    target = jax.random.randint(k2, (N,), 0, C, dtype=jnp.int32)

    ref = _reference(logits, target)

    # Forced multi-tile path: block_rows=8 -> 3 grid steps, last tile padded
    # (exercises the masked-row + parallel partial-sum path).
    loss_tiled = jax.block_until_ready(
        custom_punitive_loss(logits, target, block_rows=8))
    # Byte-auto-sized path (single full block at this demo size).
    loss_auto = jax.block_until_ready(custom_punitive_loss(logits, target))

    assert jnp.allclose(loss_tiled, ref, atol=1e-5, rtol=1e-5), (loss_tiled, ref)
    assert jnp.allclose(loss_auto, ref, atol=1e-5, rtol=1e-5), (loss_auto, ref)

    print("KERNEL_OK")
</pallas_src>

<mosaic_0001>
module attributes {stable_mosaic.version = 11 : i64} {
  func.func @_punitive_loss_kernel(%arg0: i32, %arg1: memref<8x128xf32, #tpu.memory_space<vmem>>, %arg2: memref<8x1xi32, #tpu.memory_space<vmem>>, %arg3: memref<1x8x128xf32, #tpu.memory_space<vmem>>) attributes {dimension_semantics = [#tpu.dimension_semantics<parallel>], iteration_bounds = array<i64: 3>, scalar_prefetch = 0 : i64, scratch_operands = 0 : i64, tpu.core_type = #tpu.core_type<tc>, window_params = [{transform_indices = @transform_0, window_bounds = array<i64: 8, 128>}, {transform_indices = @transform_1, window_bounds = array<i64: 8, 1>}, {transform_indices = @transform_2, window_bounds = array<i64: 1, 8, 128>}]} {
    %c0 = arith.constant 0 : index
    %c0_0 = arith.constant 0 : index
    %0 = vector.load %arg1[%c0, %c0_0] : memref<8x128xf32, #tpu.memory_space<vmem>>, vector<8x128xf32>
    %c0_1 = arith.constant 0 : index
    %c0_2 = arith.constant 0 : index
    %1 = vector.load %arg2[%c0_1, %c0_2] : memref<8x1xi32, #tpu.memory_space<vmem>>, vector<8x1xi32>
    %cst = arith.constant dense<0xFF800000> : vector<8xf32>
    %2 = vector.multi_reduction <maximumf>, %0, %cst [1] : vector<8x128xf32> to vector<8xf32>
    %3 = vector.shape_cast %2 : vector<8xf32> to vector<8x1xf32>
    %4 = vector.broadcast %3 : vector<8x1xf32> to vector<8x128xf32>
    %5 = arith.subf %0, %4 : vector<8x128xf32>
    %6 = math.exp %5 : vector<8x128xf32>
    %cst_3 = arith.constant dense<0.000000e+00> : vector<8xf32>
    %7 = vector.multi_reduction <add>, %6, %cst_3 [1] : vector<8x128xf32> to vector<8xf32>
    %8 = vector.shape_cast %7 : vector<8xf32> to vector<8x1xf32>
    %9 = arith.mulf %6, %6 : vector<8x128xf32>
    %cst_4 = arith.constant dense<0.000000e+00> : vector<8xf32>
    %10 = vector.multi_reduction <add>, %9, %cst_4 [1] : vector<8x128xf32> to vector<8xf32>
    %11 = vector.shape_cast %10 : vector<8xf32> to vector<8x1xf32>
    %12 = tpu.reciprocal %8 : vector<8x1xf32> -> vector<8x1xf32>
    %13 = math.log %8 : vector<8x1xf32>
    %14 = tpu.iota {dimensions = array<i32: 1>} : vector<8x128xi32>
    %15 = vector.broadcast %1 : vector<8x1xi32> to vector<8x128xi32>
    %16 = arith.cmpi eq, %14, %15 : vector<8x128xi32>
    %cst_5 = arith.constant 0.000000e+00 : f32
    %17 = vector.broadcast %cst_5 : f32 to vector<8x128xf32>
    %18 = arith.select %16, %5, %17 : vector<8x128xi1>, vector<8x128xf32>
    %cst_6 = arith.constant dense<0.000000e+00> : vector<8xf32>
    %19 = vector.multi_reduction <add>, %18, %cst_6 [1] : vector<8x128xf32> to vector<8xf32>
    %20 = vector.shape_cast %19 : vector<8xf32> to vector<8x1xf32>
    %21 = math.exp %20 : vector<8x1xf32>
    %22 = arith.mulf %21, %12 : vector<8x1xf32>
    %23 = arith.subf %13, %20 : vector<8x1xf32>
    %24 = arith.mulf %12, %12 : vector<8x1xf32>
    %25 = arith.mulf %11, %24 : vector<8x1xf32>
    %cst_7 = arith.constant 1.260000e+02 : f32
    %26 = vector.broadcast %cst_7 : f32 to vector<8x1xf32>
    %27 = arith.addf %26, %25 : vector<8x1xf32>
    %cst_8 = arith.constant 1.000000e+00 : f32
    %28 = vector.broadcast %cst_8 : f32 to vector<8x1xf32>
    %29 = arith.subf %28, %22 : vector<8x1xf32>
    %30 = arith.mulf %29, %29 : vector<8x1xf32>
    %31 = arith.subf %27, %30 : vector<8x1xf32>
    %32 = tpu.iota {dimensions = array<i32: 0>} : vector<8x1xi32>
    %c8_i32 = arith.constant 8 : i32
    %33 = arith.muli %arg0, %c8_i32 : i32
    %34 = vector.broadcast %33 : i32 to vector<8x1xi32>
    %35 = arith.addi %32, %34 : vector<8x1xi32>
    %c22_i32 = arith.constant 22 : i32
    %36 = vector.broadcast %c22_i32 : i32 to vector<8x1xi32>
    %37 = arith.cmpi slt, %35, %36 : vector<8x1xi32>
    %cst_9 = arith.constant 1.000000e-01 : f32
    %38 = vector.broadcast %cst_9 : f32 to vector<8x1xf32>
    %39 = arith.mulf %38, %31 : vector<8x1xf32>
    %40 = arith.addf %23, %39 : vector<8x1xf32>
    %cst_10 = arith.constant 0.000000e+00 : f32
    %41 = vector.broadcast %cst_10 : f32 to vector<8x1xf32>
    %42 = arith.select %37, %40, %41 : vector<8x1xi1>, vector<8x1xf32>
    %43 = vector.shape_cast %42 : vector<8x1xf32> to vector<1x8x1xf32>
    %cst_11 = arith.constant dense<0.000000e+00> : vector<1xf32>
    %44 = vector.multi_reduction <add>, %43, %cst_11 [1, 2] : vector<1x8x1xf32> to vector<1xf32>
    %45 = vector.shape_cast %44 : vector<1xf32> to vector<1x1x1xf32>
    %46 = vector.extract %45[0, 0, 0] : f32 from vector<1x1x1xf32>
    %47 = vector.broadcast %46 : f32 to vector<1x8x128xf32>
    %c0_12 = arith.constant 0 : index
    %c0_13 = arith.constant 0 : index
    %c0_14 = arith.constant 0 : index
    %48 = vector.load %arg3[%c0_12, %c0_13, %c0_14] : memref<1x8x128xf32, #tpu.memory_space<vmem>>, vector<1x8x128xf32>
    tpu.vector_store %arg3[%c0_12, %c0_13, %c0_14], %47 {strides = array<i32>} : memref<1x8x128xf32, #tpu.memory_space<vmem>>, vector<1x8x128xf32>,
    return
  }
  func.func @transform_0(%arg0: i32) -> (i32, i32) {
    %c0_i32 = arith.constant 0 : i32
    %c0_i32_0 = arith.constant 0 : i32
    return %arg0, %c0_i32 : i32, i32
  }
  func.func @transform_1(%arg0: i32) -> (i32, i32) {
    %c0_i32 = arith.constant 0 : i32
    %c0_i32_0 = arith.constant 0 : i32
    return %arg0, %c0_i32 : i32, i32
  }
  func.func @transform_2(%arg0: i32) -> (i32, i32, i32) {
    %c0_i32 = arith.constant 0 : i32
    %c0_i32_0 = arith.constant 0 : i32
    %c0_i32_1 = arith.constant 0 : i32
    return %arg0, %c0_i32, %c0_i32_0 : i32, i32, i32
  }
}

</mosaic_0001>

<bundles_post_ra>
// kernel: tpu_custom_call.1
= control target key start
LH: loop header
LB: loop body
LE: loop exit
PB: predicated region body
PF: predicated region fallthrough
CT: control target
= control target key end

     0   :  { %7 = vsyncpa [#allocation3], 0  ;;  %s536_s0 = inlined_call_operand.vmem [shape: f32[22,128], index: 0, kind: input, shape index: {}]   ;;  %s537_s1 = inlined_call_operand.vmem [shape: s32[22,1], index: 1, kind: input, shape index: {}]   ;;  %s538_s2 = inlined_call_operand.hbm [shape: f32[3,8,128], index: 2, kind: output, shape index: {}]  }
   0x1   :  { %9 = vsyncpa [#allocation3 + $0x1], 0  ;;  %s439_s9 = smov 0   ;;  %s441_s10 = smov 0  }
   0x2   :  { %s443_s11 = smov 0   ;;  %s445_s12 = smov 0  }
   0x3 LB: > { %s460_s13 = sadd.s32 4294967295, %s420_s12   ;;  %s297_s14 = sadd.s32 4294967294, %s420_s12   ;;  %s420_s12 = sphi %s445_s12, %s544_s12   ;;  %s416_s11 = sphi %s443_s11, %s543_s11   ;;  %s412_s10 = sphi %s441_s10, %s542_s10   ;;  %s408_s9 = sphi %s439_s9, %s541_s9  }
   0x4   : > { %s464_s15 = sadd.s32 1, %s420_s12   ;;  %s74_s16 = sadd.s32 1, %s416_s11 }
   0x5   : > { %s71_s17 = ssub.s32 %s420_s12, %s464_s15  ;;  %p84_p0 = scmp.ne.s32.totalorder %s416_s11, %s412_s10 }
   0x6   : > { %p72_p1 = scmp.eq.s32.totalorder %s71_s17, 0  ;;  %p85_p2 = scmp.eq.s32.totalorder %s460_s13, 2 }
   0x7   : > { %p90_p3 = scmp.ne.s32.totalorder %s412_s10, %s408_s9  ;;  %p91_p4 = scmp.eq.s32.totalorder %s297_s14, 2 }
   0x8   : > { %s475_s18 = scalar_select %p72_p1, %s416_s11, %s74_s16  }
   0x9   : > { %p477_p5 = por %p85_p2, %p84_p0  ;;  %p481_p6 = por %p91_p4, %p90_p3 }
   0xa   : > { %p300_p7 = scmp.ge.s32.totalorder %s420_s12, 1  ;;  %p123_p8 = scmp.lt.s32.totalorder %s420_s12, 4 }
   0xc   : > { %p124_p9 = pnand %p300_p7, %p123_p8 }
   0xd   : > { %p148_p10 = scmp.lt.s32.totalorder (!%p124_p9), %s460_s13, 2  ;;  %s304_s29 = sshll.u32 (!%p124_p9), %s460_s13, 3 }
   0xe   : > { %127 = sbr.rel (%p124_p9) target bundleno = 560 (0x230), region = 28  ;;  %s145_s30 = sand.u32 (!%p124_p9), 1, %s412_s10  }
   0xf   : > { %s301_s3 = sshll.u32 (!%p124_p9), %s145_s30, 3  ;;  %s306_s6 = sshll.u32 (!%p124_p9), %s460_s13, 7 }
  0x10   : > { %s147_s4 = scalar_lea.vmem (!%p124_p9), [#allocation2], %s301_s3  ;;  %s224_s16 = scalar_lea.hbm (!%p124_p9), %s538_s2, %s306_s6 }
  0x11   : > { %s226_s5 = sshll.u32 (!%p124_p9), %s147_s4, 4  ;;  %s213_s17 = scalar_lea.sflag (!%p124_p9), [#allocation3], %s145_s30  ;;  %s498_s5 = int_to_ptr.vmem [resolvable:$true] %s226_s5 }
  0x13   : > { %v422_v0 = vmov 0   ;;  %s149_s21 = scalar_select %p148_p10, %s460_s13, 2  ;;  %v171_v5 = vlaneseq  ;;  %v193_v24 = vstv %s304_s29  ;;  %vm199_vm2 = vcmask 7168  }
  0x14   : > { %351 = vset.pattern.permute.xlu0 %v422_v0 }
  0x15   : > { %s302_s22 = sshll.u32 %s149_s21, 3  ;;  %v172_v7 = vand.u32 127, %v171_v5  ;;  %v191_v21 = vshrl.u32 %v171_v5, 7  ;;  %s360_s21 = scalar_lea.vmem %s498_s5, 128 }
  0x16   : > { %s151_s25 = scalar_lea.vmem %s536_s0, %s302_s22  ;;  %s155_s28 = scalar_lea.vmem %s537_s1, %s302_s22 }
  0x17   : > { %v156_v1 = vld [vmem:[%s151_s25] sm:$0xff]  ;;  %v194_v28 = vadd.s32 %v193_v24, %v191_v21  ;;  %p361_p11 = scmp.ne.s32.totalorder %s498_s5, %s360_s21  ;;  %s423_s22 = smov [#allocation2]  }
  0x18   : > { %158 = vmax.xlane.f32.xlu0 %v156_v1  ;;  %v157_v2 = vld [vmem:[%s155_s28] sm:$0xff]  ;;  %s364_s13 = sshll.u32 %s423_s22, 4  ;;  %s365_s13 = int_to_ptr.vmem [resolvable:$false] %s364_s13 }
  0x19   : > { %vm195_vm1 = vcmp.lt.s32.totalorder %v194_v28, 22  ;;  %p362_p12 = pnand %p361_p11, %p477_p5  ;;  %s366_s23 = scalar_lea.vmem %s365_s13, 256 }
  0x1a   : > { %p367_p0 = scmp.lt.s32.totalorder %s498_s5, %s365_s13  ;;  %p368_p1 = scmp.lt.s32.totalorder %s366_s23, %s360_s21 }
  0x1b   : > { %p363_p13 = pneg %p362_p12 }
  0x1c   : > { %p369_p2 = por %p368_p1, %p367_p0 }
  0x1e   : > { %p370_p3 = pnand %p369_p2, %p363_p13 }
  0x2e   : > { %174 = vperm.xlu0 %351, %v157_v2  }
  0xa1   : > { %v159_v3 = vpop.xlane.xlu0 %158 }
  0xa2   : > { %v160_v4 = vsub.f32 %v156_v1, %v159_v3 }
  0xa4   : > { %v161_v6 = vmul.f32 1.442695, %v160_v4 }
  0xa6   : > { %352 = vpow2.f32 %v161_v6 }
  0xa9   : > { %v175_v8 = vpop.permute.xlu0 %174 }
  0xaa   : > { %vm176_vm0 = vcmp.eq.s32.totalorder %v172_v7, %v175_v8 }
  0xab   : > { %v177_v9 = vsel %vm176_vm0, %v160_v4, 0.0 }
  0xac   : > { %178 = vadd.xlane.f32.xlu1 %v177_v9 }
  0xb3   : > { %v353_v10 = vpop.eup %352 }
  0xb4   : > { %163 = vadd.xlane.f32.xlu1 %v353_v10  ;;  %v165_v11 = vmul.f32 %v353_v10, %v353_v10 }
  0xb8   : > { %166 = vadd.xlane.f32.xlu1 %v165_v11 }
 0x135   : > { %v179_v12 = vpop.xlane.xlu1 %178 }
 0x136   : > { %v180_v13 = vmul.f32 1.442695, %v179_v12 }
 0x138   : > { %354 = vpow2.f32 %v180_v13 }
 0x13d   : > { %v164_v14 = vpop.xlane.xlu1 %163 }
 0x13e   : > { %356 = vrcp.f32 %v164_v14 }
 0x13f   : > { %358 = vlog2.f32 %v164_v14 }
 0x141   : > { %v167_v20 = vpop.xlane.xlu1 %166 }
 0x145   : > { %v355_v15 = vpop.eup %354 }
 0x14b   : > { %v357_v16 = vpop.eup %356 }
 0x14c   : > { %v182_v17 = vmul.f32 %v357_v16, %v355_v15  ;;  %v184_v18 = vmul.f32 %v357_v16, %v357_v16  ;;  %v359_v19 = vpop.eup %358 }
 0x14d   : > { %v170_v25 = vmul.f32 0.6931472, %v359_v19 }
 0x14e   : > { %v187_v22 = vsub.f32 1.0, %v182_v17  ;;  %v185_v23 = vmul.f32 %v184_v18, %v167_v20 }
 0x14f   : > { %v183_v31 = vsub.f32 %v170_v25, %v179_v12 }
 0x150   : > { %v188_v26 = vmul.f32 %v187_v22, %v187_v22  ;;  %v186_v27 = vadd.f32 126.0, %v185_v23 }
 0x152   : > { %v189_v29 = vsub.f32 %v186_v27, %v188_v26 }
 0x154   : > { %v196_v30 = vmul.f32 0.1, %v189_v29 }
 0x156   : > { %v197_v32 = vadd.f32 %v196_v30, %v183_v31 }
 0x158   : > { %v198_v33 = vsel %vm195_vm1, %v197_v32, 0.0 }
 0x159   : > { %v200_v34 = vsel %vm199_vm2, %v198_v33, 0.0 }
 0x15a   : > { %201 = vadd.xlane.f32.xlu1 %v200_v34 }
 0x1e3   : > { %v202_v35 = vpop.xlane.xlu1 %201 }
 0x1e4   : > { %v203_v36 = vrot.slane %v202_v35, 4 }
 0x1e6   : > { %v204_v37 = vadd.f32 %v203_v36, %v202_v35 }
 0x1e8   : > { %v205_v38 = vrot.slane %v204_v37, 2 }
 0x1ea   : > { %v206_v39 = vadd.f32 %v205_v38, %v204_v37 }
 0x1ec   : > { %v207_v40 = vrot.slane %v206_v39, 1 }
 0x1ee   : > { %v208_v41 = vadd.f32 %v207_v40, %v206_v39 }
 0x1f0   : > { %309 = vpush %v208_v41 }
 0x221   : > { %s310_s7 = spop %309 }
 0x222   : > { %v210_v42 = vstv %s310_s7 }
 0x223   : > { %211 = vst [vmem:[%s147_s4] sm:$0xff] %v210_v42 }
 0x224   : > { %373 = shalt.err (!%p370_p3)
}
 0x225   : > { %s374_s24 = scalar_lea.hbm %s224_s16, 128  ;;  %s378_s27 = scalar_lea.hbm %s538_s2, 384 }
 0x226   : > { %p375_p4 = scmp.ne.s32.totalorder %s224_s16, %s374_s24  ;;  %p379_p9 = scmp.lt.s32.totalorder %s224_s16, %s538_s2 }
 0x227   : > { %p380_p10 = scmp.lt.s32.totalorder %s378_s27, %s374_s24 }
 0x228   : > { %p376_p7 = pnand %p375_p4, %p477_p5 }
 0x229   : > { %p381_p11 = por %p380_p10, %p379_p9 }
 0x22a   : > { %p377_p8 = pneg %p376_p7 }
 0x22c   : > { %p382_p12 = pnand %p381_p11, %p377_p8 }
 0x22e   : > { %385 = shalt.err (!%p382_p12)
}
 0x22f   : > { %311 = dma.vmem_to_hbm [thread:$0]  (%p477_p5), %s498_s5, 128, %s224_s16, %s213_s17  }
 0x230 PF: > { %p317_p13 = scmp.ge.s32.totalorder %s420_s12, 2  ;;  %s238_s30 = sand.u32 1, %s408_s9  }
 0x231   : > { %s239_s3 = scalar_lea.sflag [#allocation3], %s238_s30 }
 0x232   : > { %p314_p0 = pnand %p317_p13, %p481_p6 }
 0x234   : > { %p315_p1 = pneg %p314_p0 }
 0x236   : > { %403 = dma.done.wait (%p315_p1), %s239_s3, 128  }
 0x237   : > { %405 = vsyncadd (%p315_p1), %s239_s3, 4294967168  ;;  %p12_p2 = scmp.ge.s32.totalorder %s464_s15, 5   ;;  %s541_s9 = smov %s412_s10 }
 0x238   : > { %s542_s10 = smov %s416_s11  ;;  %s543_s11 = smov %s475_s18 }
 0x239   : > { %s544_s12 = smov %s464_s15  ;;  %14 = sbr.rel (!%p12_p2) target bundleno = 3 (0x3), region = 66 }
 0x23e   :  { %244 = vsyncpa [#allocation3], 1 }
 0x23f   :  { %246 = vsyncpa [#allocation3 + $0x1], 1 }

</bundles_post_ra>
